<compile_context>
chip_gen: v5e
topology: v5e:2x2
jax: 0.10.0
libtpu: 0.0.40
codegen_flags: <defaults>
</compile_context>

<pallas_src>
import numpy as np
import jax
import jax.numpy as jnp
from jax import lax
from jax.experimental import pallas as pl
from jax.experimental.pallas import tpu as pltpu


def _vmem_limit_bytes(requested):
    """Scoped-VMEM request from the actual footprint, capped below physical VMEM."""
    try:
        phys = int(pltpu.get_tpu_info().vmem_capacity_bytes)
    except Exception:
        phys = 128 * 1024 * 1024
    cap = (3 * phys) // 4                      # ~48 MiB on v7x, ~96 MiB on v5e/v6e
    return int(min(max(32 * 1024 * 1024, int(requested)), cap))


def _child_tile(S):
    """Child (lane) tile: full S for small sequences, else a 128-multiple divisor."""
    if S <= 512:
        return S
    for t in (512, 384, 256, 128):
        if S % t == 0:
            return t
    return S


# ----------------------------------------------------------------------------
# Fused kernel: arc transform + pairwise distances + softmin + label logits.
# Grid = (batch, child_tile); child axis is "arbitrary" (scratch carried).
# ----------------------------------------------------------------------------
def _probe_kernel(emb0_ref, emb1_ref, attr_ref, attc_ref, warc_ref, w1t_ref,
                  w2_ref, dep_ref, dist_ref, lbl_ref, dep_sc, sq_sc, apar_sc):
    c = pl.program_id(1)
    S = emb0_ref.shape[1]
    T = dist_ref.shape[2]
    L = w2_ref.shape[0]
    D = warc_ref.shape[1]                       # lane-padded probe rank
    neg_inf = jnp.float32(-jnp.inf)

    # ---- per-batch work (first child tile only): stays resident in scratch ----
    @pl.when(c == 0)
    def _():
        x0 = emb0_ref[0]                                                    # (S, E)
        dep = jnp.dot(x0, warc_ref[...], preferred_element_type=jnp.float32)  # (S, D)
        dep_sc[...] = dep
        dep_ref[0] = dep                                   # lane-dense (D padded)
        # ||dep_i||^2 as an (S, 1) column — O(S*D) VPU + one lane reduction,
        # replacing the Gram-diagonal extraction (review item 4).
        sq_sc[...] = jnp.sum(dep * dep, axis=1, keepdims=True)

        # Parent half of Linear(2E -> L): a_par[j, l] = emb1[j] . W_lbl[l, :E].
        # Invalid parents are -inf'ed ONCE here (hoisted out of the label loop).
        x1 = emb1_ref[0]                                                    # (S, E)
        a_par = jnp.dot(x1, w1t_ref[...], preferred_element_type=jnp.float32)  # (S, L)
        att_par = attc_ref[0] > 0.5                                         # (S, 1)
        apar_sc[...] = jnp.where(att_par, a_par, neg_inf)

    # ---- per-child-tile work ---------------------------------------------------
    start = pl.multiple_of(c * T, T)            # 0 or a multiple of 128
    dep = dep_sc[...]                                                        # (S, D)
    dep_t = dep_sc[pl.ds(start, T), :]                                       # (T, D)
    ones_d = jnp.ones((1, D), jnp.float32)
    # Child squared norms as a lane row via the (idle) MXU — avoids a transpose.
    sq_chl = lax.dot_general(ones_d, dep_t * dep_t, (((1,), (1,)), ((), ())),
                             preferred_element_type=jnp.float32)             # (1, T)
    # Gram tile on the MXU; distances via the Gram identity (symmetric, so the
    # [parent, child-tile] plane is directly the distances[:, tile] block).
    g = lax.dot_general(dep, dep_t, (((1,), (1,)), ((), ())),
                        preferred_element_type=jnp.float32)                  # (S, T)
    dist_t = jnp.maximum(sq_sc[...] + sq_chl - 2.0 * g, 0.0)
    dist_ref[0] = dist_t

    # softmin over the parent (sublane) axis, computed in [parent, child] layout.
    nd = -dist_t
    mmax = jnp.max(nd, axis=0, keepdims=True)                                # (1, T)
    ex = jnp.exp(nd - mmax)
    denom = jnp.sum(ex, axis=0, keepdims=True)                               # (1, T)
    pp_t = ex * pl.reciprocal(denom, approx=False)                           # (S, T)

    # Child half of the label linear for this tile; invalid children -inf'ed once.
    x1_t = emb1_ref[0, pl.ds(start, T), :]                                   # (T, E)
    b_chl = lax.dot_general(w2_ref[...], x1_t, (((1,), (1,)), ((), ())),
                            preferred_element_type=jnp.float32)              # (L, T)
    b_chl = jnp.where(attr_ref[0] > 0.5, b_chl, neg_inf)

    # Remaining per-pair mask: child != parent (the reference always -inf's the
    # diagonal "start token" pairs, so only pp[i,i] reaches the sum — as here).
    prow = lax.broadcasted_iota(jnp.int32, (S, T), 0)
    ccol = lax.broadcasted_iota(jnp.int32, (S, T), 1) + start
    diag_ok = prow != ccol

    ones_s = jnp.ones((1, S), jnp.float32)      # hoisted out of the label loop
    rows = []
    # TODO(synk): for production-sized L use lax.fori_loop with a VMEM (L, T)
    # accumulator to bound live ranges; static unroll is fine for tiny L.
    for l in range(L):
        z = apar_sc[:, l:l + 1] + b_chl[l:l + 1, :]          # (S, T); -inf if invalid
        z = jnp.where(diag_ok, z, neg_inf)
        hi = jnp.maximum(z, pp_t)
        lo = jnp.minimum(z, pp_t)
        # logaddexp(z, pp): 2 transcendentals; -inf-safe since pp is finite.
        lae = hi + jnp.log(1.0 + jnp.exp(lo - hi))
        # Parent-axis reduction on the MXU (ones-vector matmul), off the XLU.
        rows.append(jnp.dot(ones_s, lae, preferred_element_type=jnp.float32))  # (1, T)
    lbl_ref[0] = jnp.concatenate(rows, axis=0)               # single unmasked (L, T) store


def retro_probe_pallas(emb0, emb1, att, W_arc, W_lbl):
    B, S, E = emb0.shape
    D = W_arc.shape[0]
    L = W_lbl.shape[0]
    T = _child_tile(S)
    assert S % T == 0
    CT = S // T

    # nn.Linear weights are (out, in); arc weight and the parent half of the
    # label weight are consumed transposed, the child half untransposed.
    D_pad = max(128, ((D + 127) // 128) * 128)
    warc_t = W_arc.T                            # (E, D)
    if D_pad != D:
        warc_t = jnp.pad(warc_t, ((0, 0), (0, D_pad - D)))   # zero lanes: dist unchanged
    w1_t = W_lbl[:, :E].T                       # (E, L) — parent half
    w2 = W_lbl[:, E:]                           # (L, E) — child half

    att_f = att.astype(jnp.float32)
    att_row = att_f[:, None, :]                 # (B, 1, S) — child validity (lanes)
    att_col = att_f[:, :, None]                 # (B, S, 1) — parent validity (sublanes)

    f32 = 4
    per_step = f32 * (2 * S * E + S + T + E * D_pad + 2 * E * L
                      + S * D_pad + S * T + L * T)
    scratch = f32 * (S * D_pad + S + S * L)
    live = f32 * (12 * S * T + T * E + 2 * L * T)
    vmem_req = 2 * per_step + scratch + live

    out_shape = (
        jax.ShapeDtypeStruct((B, S, D_pad), jnp.float32),   # dep (lane padded)
        jax.ShapeDtypeStruct((B, S, S), jnp.float32),       # distances
        jax.ShapeDtypeStruct((B, L, S), jnp.float32),       # label logits, lane-dense
    )
    dep_pad, distances, out_ls = pl.pallas_call(
        _probe_kernel,
        out_shape=out_shape,
        grid_spec=pltpu.PrefetchScalarGridSpec(
            num_scalar_prefetch=0,
            grid=(B, CT),
            in_specs=[
                pl.BlockSpec((1, S, E), lambda b, c: (b, 0, 0)),     # emb layer 0
                pl.BlockSpec((1, S, E), lambda b, c: (b, 0, 0)),     # emb layer 1
                pl.BlockSpec((1, 1, T), lambda b, c: (b, 0, c)),     # att, child tile (lanes)
                pl.BlockSpec((1, S, 1), lambda b, c: (b, 0, 0)),     # att, parents (sublanes)
                pl.BlockSpec((E, D_pad), lambda b, c: (0, 0)),       # W_arc.T (padded)
                pl.BlockSpec((E, L), lambda b, c: (0, 0)),           # W_lbl[:, :E].T
                pl.BlockSpec((L, E), lambda b, c: (0, 0)),           # W_lbl[:, E:]
            ],
            out_specs=(
                pl.BlockSpec((1, S, D_pad), lambda b, c: (b, 0, 0)),
                pl.BlockSpec((1, S, T), lambda b, c: (b, 0, c)),
                pl.BlockSpec((1, L, T), lambda b, c: (b, 0, c)),
            ),
            scratch_shapes=[
                pltpu.VMEM((S, D_pad), jnp.float32),   # dep (resident per batch)
                pltpu.VMEM((S, 1), jnp.float32),       # ||dep||^2 (parent column)
                pltpu.VMEM((S, L), jnp.float32),       # parent label projection (-inf masked)
            ],
        ),
        compiler_params=pltpu.CompilerParams(
            dimension_semantics=("parallel", "arbitrary"),
            vmem_limit_bytes=_vmem_limit_bytes(vmem_req),
        ),
    )(emb0, emb1, att_row, att_col, warc_t, w1_t, w2)

    dep_embeddings = dep_pad[..., :D] if D_pad != D else dep_pad
    label_logits = jnp.transpose(out_ls, (0, 2, 1))          # (B, S, L)
    return dep_embeddings, distances, label_logits


# ----------------------------------------------------------------------------
# Decoding glue (plain JAX / host numpy)
# ----------------------------------------------------------------------------
def get_labels(lbl_logits, root_label):
    p = jax.nn.softmax(lbl_logits, axis=-1)
    p = jnp.where(jnp.isnan(p), -jnp.inf, p)                 # nan_to_num(nan=-inf)
    roots = jnp.argmax(p[:, :, root_label], axis=-1)
    p_noroot = p.at[:, :, root_label].set(-jnp.inf)
    labels = jnp.argmax(p_noroot, axis=-1)
    B = p.shape[0]
    labels = labels.at[jnp.arange(B), roots].set(root_label)
    labels = jnp.where(p[:, :, 0] == -jnp.inf, -1, labels)
    return roots, labels


def to_graph(roots, distances, mask):
    # TODO(synk): data-dependent greedy MST decode has no clean Pallas equivalent;
    # reproduced exactly on host in numpy.
    roots = np.asarray(roots)
    distances = np.asarray(distances)
    mask = np.asarray(mask)
    graphs = np.full(mask.shape, -2, dtype=np.int64)
    for sidx in range(graphs.shape[0]):
        sen_len = int(mask[sidx].sum())
        sen_root = int(roots[sidx])
        graphs[sidx, sen_root] = -1
        tree_nodes = [sen_root]
        free_nodes = [n for n in range(sen_len) if n != sen_root]
        while free_nodes:
            cur = distances[sidx][np.array(tree_nodes)][:, np.array(free_nodes)]
            idx = int(np.argmin(cur))
            min_tree = tree_nodes[idx // len(free_nodes)]
            min_free = free_nodes[idx % len(free_nodes)]
            graphs[sidx, min_free] = min_tree
            tree_nodes.append(min_free)
            free_nodes.remove(min_free)
    return graphs


# ----------------------------------------------------------------------------
# RetroProbe forward
# ----------------------------------------------------------------------------
def retro_probe_forward(emb0, emb1, att, W_arc, W_lbl, root_label, decode=True):
    dep_embeddings, distances, label_logits = retro_probe_pallas(
        emb0, emb1, att, W_arc, W_lbl)
    results = {
        "dependency_embeddings": dep_embeddings,
        "distances": distances,
        "label_logits": label_logits,
    }
    if decode:
        roots, labels = get_labels(label_logits, root_label)
        graphs = to_graph(roots, distances, att)
        results["graphs"] = graphs
        results["labels"] = labels
    return results


if __name__ == "__main__":
    B, S, E, D = 2, 8, 32, 16
    dep_rels = ["root", "nsubj", "obj", "det", "amod", "advmod", "case", "punct"]
    L = len(dep_rels)
    root_label = dep_rels.index("root")

    key = jax.random.PRNGKey(0)
    k0, k1, k2, k3 = jax.random.split(key, 4)
    # Synthetic outputs of the frozen embedding model: two layers + attention mask.
    emb_layer0 = jax.random.normal(k0, (B, S, E), jnp.float32)
    emb_layer1 = jax.random.normal(k1, (B, S, E), jnp.float32)
    lengths = jnp.array([6, 8], dtype=jnp.int32)
    att = jnp.arange(S)[None, :] < lengths[:, None]            # (B, S) bool

    # Deterministic parameter init (nn.Linear(in, out, bias=False).weight shapes).
    W_arc = 0.1 * jax.random.normal(k2, (D, E), jnp.float32)       # RootedGraphPredictor
    W_lbl = 0.1 * jax.random.normal(k3, (L, 2 * E), jnp.float32)   # DependencyLabelClassifier

    results = retro_probe_forward(emb_layer0, emb_layer1, att, W_arc, W_lbl,
                                  root_label, decode=True)

    jax.block_until_ready((results["dependency_embeddings"],
                           results["distances"],
                           results["label_logits"],
                           results["labels"]))
    _ = np.asarray(results["graphs"])
    print("KERNEL_OK")
</pallas_src>

<mosaic_0001>
module attributes {stable_mosaic.version = 11 : i64} {
  func.func @_probe_kernel(%arg0: i32, %arg1: i32, %arg2: memref<1x8x32xf32, #tpu.memory_space<vmem>>, %arg3: memref<1x8x32xf32, #tpu.memory_space<vmem>>, %arg4: memref<1x1x8xf32, #tpu.memory_space<vmem>>, %arg5: memref<1x8x1xf32, #tpu.memory_space<vmem>>, %arg6: memref<32x128xf32, #tpu.memory_space<vmem>>, %arg7: memref<32x8xf32, #tpu.memory_space<vmem>>, %arg8: memref<8x32xf32, #tpu.memory_space<vmem>>, %arg9: memref<1x8x128xf32, #tpu.memory_space<vmem>>, %arg10: memref<1x8x8xf32, #tpu.memory_space<vmem>>, %arg11: memref<1x8x8xf32, #tpu.memory_space<vmem>>, %arg12: memref<8x128xf32, #tpu.memory_space<vmem>>, %arg13: memref<8x1xf32, #tpu.memory_space<vmem>>, %arg14: memref<8x8xf32, #tpu.memory_space<vmem>>) attributes {dimension_semantics = [#tpu.dimension_semantics<parallel>, #tpu.dimension_semantics<arbitrary>], iteration_bounds = array<i64: 2, 1>, scalar_prefetch = 0 : i64, scratch_operands = 3 : i64, tpu.core_type = #tpu.core_type<tc>, window_params = [{transform_indices = @transform_0, window_bounds = array<i64: 1, 8, 32>}, {transform_indices = @transform_1, window_bounds = array<i64: 1, 8, 32>}, {transform_indices = @transform_2, window_bounds = array<i64: 1, 1, 8>}, {transform_indices = @transform_3, window_bounds = array<i64: 1, 8, 1>}, {pipeline_mode = #tpu.pipeline_mode<synchronous>, transform_indices = @transform_4, window_bounds = array<i64: 32, 128>}, {pipeline_mode = #tpu.pipeline_mode<synchronous>, transform_indices = @transform_5, window_bounds = array<i64: 32, 8>}, {pipeline_mode = #tpu.pipeline_mode<synchronous>, transform_indices = @transform_6, window_bounds = array<i64: 8, 32>}, {transform_indices = @transform_7, window_bounds = array<i64: 1, 8, 128>}, {transform_indices = @transform_8, window_bounds = array<i64: 1, 8, 8>}, {transform_indices = @transform_9, window_bounds = array<i64: 1, 8, 8>}]} {
    %c0_i32 = arith.constant 0 : i32
    %0 = arith.cmpi eq, %arg1, %c0_i32 : i32
    %1 = arith.extui %0 : i1 to i32
    %cst = arith.constant 0xFF800000 : f32
    %c0_i32_0 = arith.constant 0 : i32
    %2 = arith.cmpi ne, %1, %c0_i32_0 : i32
    scf.if %2 {
      %c0_63 = arith.constant 0 : index
      %c0_64 = arith.constant 0 : index
      %c0_65 = arith.constant 0 : index
      %187 = vector.load %arg2[%c0_63, %c0_64, %c0_65] : memref<1x8x32xf32, #tpu.memory_space<vmem>>, vector<1x8x32xf32>
      %188 = vector.shape_cast %187 : vector<1x8x32xf32> to vector<8x32xf32>
      %c0_66 = arith.constant 0 : index
      %c0_67 = arith.constant 0 : index
      %189 = vector.load %arg6[%c0_66, %c0_67] : memref<32x128xf32, #tpu.memory_space<vmem>>, vector<32x128xf32>
      %cst_68 = arith.constant dense<0.000000e+00> : vector<8x128xf32>
      %190 = tpu.matmul %188, %189, %cst_68 {dimension_numbers = #tpu.dot_dimension_numbers<[1], [0], [0], [1], [0, 0, 1, 1], [], []>} : vector<8x32xf32>, vector<32x128xf32>, vector<8x128xf32> -> vector<8x128xf32>
      %c0_69 = arith.constant 0 : index
      %c0_70 = arith.constant 0 : index
      %191 = vector.load %arg12[%c0_69, %c0_70] : memref<8x128xf32, #tpu.memory_space<vmem>>, vector<8x128xf32>
      tpu.vector_store %arg12[%c0_69, %c0_70], %190 {strides = array<i32>} : memref<8x128xf32, #tpu.memory_space<vmem>>, vector<8x128xf32>,
      %c0_71 = arith.constant 0 : index
      %c0_72 = arith.constant 0 : index
      %c0_73 = arith.constant 0 : index
      %192 = vector.load %arg9[%c0_71, %c0_72, %c0_73] : memref<1x8x128xf32, #tpu.memory_space<vmem>>, vector<1x8x128xf32>
      %193 = vector.shape_cast %192 : vector<1x8x128xf32> to vector<8x128xf32>
      %194 = vector.shape_cast %190 : vector<8x128xf32> to vector<1x8x128xf32>
      tpu.vector_store %arg9[%c0_71, %c0_72, %c0_73], %194 {strides = array<i32>} : memref<1x8x128xf32, #tpu.memory_space<vmem>>, vector<1x8x128xf32>,
      %195 = arith.mulf %190, %190 : vector<8x128xf32>
      %cst_74 = arith.constant dense<0.000000e+00> : vector<8xf32>
      %196 = vector.multi_reduction <add>, %195, %cst_74 [1] : vector<8x128xf32> to vector<8xf32>
      %197 = vector.shape_cast %196 : vector<8xf32> to vector<8x1xf32>
      %c0_75 = arith.constant 0 : index
      %c0_76 = arith.constant 0 : index
      %198 = vector.load %arg13[%c0_75, %c0_76] : memref<8x1xf32, #tpu.memory_space<vmem>>, vector<8x1xf32>
      tpu.vector_store %arg13[%c0_75, %c0_76], %197 {strides = array<i32>} : memref<8x1xf32, #tpu.memory_space<vmem>>, vector<8x1xf32>,
      %c0_77 = arith.constant 0 : index
      %c0_78 = arith.constant 0 : index
      %c0_79 = arith.constant 0 : index
      %199 = vector.load %arg3[%c0_77, %c0_78, %c0_79] : memref<1x8x32xf32, #tpu.memory_space<vmem>>, vector<1x8x32xf32>
      %200 = vector.shape_cast %199 : vector<1x8x32xf32> to vector<8x32xf32>
      %c0_80 = arith.constant 0 : index
      %c0_81 = arith.constant 0 : index
      %201 = vector.load %arg7[%c0_80, %c0_81] : memref<32x8xf32, #tpu.memory_space<vmem>>, vector<32x8xf32>
      %cst_82 = arith.constant dense<0.000000e+00> : vector<8x8xf32>
      %202 = tpu.matmul %200, %201, %cst_82 {dimension_numbers = #tpu.dot_dimension_numbers<[1], [0], [0], [1], [0, 0, 1, 1], [], []>} : vector<8x32xf32>, vector<32x8xf32>, vector<8x8xf32> -> vector<8x8xf32>
      %c0_83 = arith.constant 0 : index
      %c0_84 = arith.constant 0 : index
      %c0_85 = arith.constant 0 : index
      %203 = vector.load %arg5[%c0_83, %c0_84, %c0_85] : memref<1x8x1xf32, #tpu.memory_space<vmem>>, vector<1x8x1xf32>
      %204 = vector.shape_cast %203 : vector<1x8x1xf32> to vector<8x1xf32>
      %cst_86 = arith.constant 5.000000e-01 : f32
      %205 = vector.broadcast %cst_86 : f32 to vector<8x1xf32>
      %206 = arith.cmpf ogt, %204, %205 : vector<8x1xf32>
      %207 = vector.shape_cast %206 : vector<8x1xi1> to vector<8x1xi1>
      %208 = vector.broadcast %207 : vector<8x1xi1> to vector<8x8xi1>
      %209 = vector.broadcast %cst : f32 to vector<8x8xf32>
      %210 = arith.select %208, %202, %209 : vector<8x8xi1>, vector<8x8xf32>
      %c0_87 = arith.constant 0 : index
      %c0_88 = arith.constant 0 : index
      %211 = vector.load %arg14[%c0_87, %c0_88] : memref<8x8xf32, #tpu.memory_space<vmem>>, vector<8x8xf32>
      tpu.vector_store %arg14[%c0_87, %c0_88], %210 {strides = array<i32>} : memref<8x8xf32, #tpu.memory_space<vmem>>, vector<8x8xf32>,
    } else {
    }
    %c8_i32 = arith.constant 8 : i32
    %3 = arith.muli %arg1, %c8_i32 : i32
    %4 = tpu.assume_multiple %3, 8 : i32
    %c0 = arith.constant 0 : index
    %c0_1 = arith.constant 0 : index
    %5 = vector.load %arg12[%c0, %c0_1] : memref<8x128xf32, #tpu.memory_space<vmem>>, vector<8x128xf32>
    %6 = arith.index_cast %4 : i32 to index
    %c0_2 = arith.constant 0 : index
    %7 = vector.load %arg12[%6, %c0_2] : memref<8x128xf32, #tpu.memory_space<vmem>>, vector<8x128xf32>
    %cst_3 = arith.constant 1.000000e+00 : f32
    %8 = vector.broadcast %cst_3 : f32 to vector<1x128xf32>
    %9 = arith.mulf %7, %7 : vector<8x128xf32>
    %cst_4 = arith.constant dense<0.000000e+00> : vector<1x8xf32>
    %10 = tpu.matmul %8, %9, %cst_4 {dimension_numbers = #tpu.dot_dimension_numbers<[1], [1], [0], [0], [0, 0, 1, 0], [], []>} : vector<1x128xf32>, vector<8x128xf32>, vector<1x8xf32> -> vector<1x8xf32>
    %cst_5 = arith.constant dense<0.000000e+00> : vector<8x8xf32>
    %11 = tpu.matmul %5, %7, %cst_5 {dimension_numbers = #tpu.dot_dimension_numbers<[1], [1], [0], [0], [0, 0, 1, 0], [], []>} : vector<8x128xf32>, vector<8x128xf32>, vector<8x8xf32> -> vector<8x8xf32>
    %c0_6 = arith.constant 0 : index
    %c0_7 = arith.constant 0 : index
    %12 = vector.load %arg13[%c0_6, %c0_7] : memref<8x1xf32, #tpu.memory_space<vmem>>, vector<8x1xf32>
    %13 = vector.broadcast %12 : vector<8x1xf32> to vector<8x8xf32>
    %14 = vector.broadcast %10 : vector<1x8xf32> to vector<8x8xf32>
    %15 = arith.addf %13, %14 : vector<8x8xf32>
    %cst_8 = arith.constant 2.000000e+00 : f32
    %16 = vector.broadcast %cst_8 : f32 to vector<8x8xf32>
    %17 = arith.mulf %16, %11 : vector<8x8xf32>
    %18 = arith.subf %15, %17 : vector<8x8xf32>
    %cst_9 = arith.constant 0.000000e+00 : f32
    %19 = vector.broadcast %cst_9 : f32 to vector<8x8xf32>
    %20 = arith.maximumf %18, %19 : vector<8x8xf32>
    %c0_10 = arith.constant 0 : index
    %c0_11 = arith.constant 0 : index
    %c0_12 = arith.constant 0 : index
    %21 = vector.load %arg10[%c0_10, %c0_11, %c0_12] : memref<1x8x8xf32, #tpu.memory_space<vmem>>, vector<1x8x8xf32>
    %22 = vector.shape_cast %21 : vector<1x8x8xf32> to vector<8x8xf32>
    %23 = vector.shape_cast %20 : vector<8x8xf32> to vector<1x8x8xf32>
    tpu.vector_store %arg10[%c0_10, %c0_11, %c0_12], %23 {strides = array<i32>} : memref<1x8x8xf32, #tpu.memory_space<vmem>>, vector<1x8x8xf32>,
    %cst_13 = arith.constant 0.000000e+00 : f32
    %24 = vector.broadcast %cst_13 : f32 to vector<8x8xf32>
    %25 = arith.subf %24, %20 : vector<8x8xf32>
    %cst_14 = arith.constant dense<0xFF800000> : vector<8xf32>
    %26 = vector.multi_reduction <maximumf>, %25, %cst_14 [0] : vector<8x8xf32> to vector<8xf32>
    %27 = vector.shape_cast %26 : vector<8xf32> to vector<1x8xf32>
    %28 = vector.broadcast %27 : vector<1x8xf32> to vector<8x8xf32>
    %29 = arith.subf %25, %28 : vector<8x8xf32>
    %30 = math.exp %29 : vector<8x8xf32>
    %cst_15 = arith.constant dense<0.000000e+00> : vector<8xf32>
    %31 = vector.multi_reduction <add>, %30, %cst_15 [0] : vector<8x8xf32> to vector<8xf32>
    %32 = vector.shape_cast %31 : vector<8xf32> to vector<1x8xf32>
    %33 = tpu.reciprocal %32 : vector<1x8xf32> -> vector<1x8xf32>
    %34 = vector.broadcast %33 : vector<1x8xf32> to vector<8x8xf32>
    %35 = arith.mulf %30, %34 : vector<8x8xf32>
    %c0_16 = arith.constant 0 : index
    %36 = arith.index_cast %4 : i32 to index
    %c0_17 = arith.constant 0 : index
    %37 = vector.load %arg3[%c0_16, %36, %c0_17] : memref<1x8x32xf32, #tpu.memory_space<vmem>>, vector<1x8x32xf32>
    %38 = vector.shape_cast %37 : vector<1x8x32xf32> to vector<8x32xf32>
    %c0_18 = arith.constant 0 : index
    %c0_19 = arith.constant 0 : index
    %39 = vector.load %arg8[%c0_18, %c0_19] : memref<8x32xf32, #tpu.memory_space<vmem>>, vector<8x32xf32>
    %cst_20 = arith.constant dense<0.000000e+00> : vector<8x8xf32>
    %40 = tpu.matmul %39, %38, %cst_20 {dimension_numbers = #tpu.dot_dimension_numbers<[1], [1], [0], [0], [0, 0, 1, 0], [], []>} : vector<8x32xf32>, vector<8x32xf32>, vector<8x8xf32> -> vector<8x8xf32>
    %c0_21 = arith.constant 0 : index
    %c0_22 = arith.constant 0 : index
    %c0_23 = arith.constant 0 : index
    %41 = vector.load %arg4[%c0_21, %c0_22, %c0_23] : memref<1x1x8xf32, #tpu.memory_space<vmem>>, vector<1x1x8xf32>
    %42 = vector.shape_cast %41 : vector<1x1x8xf32> to vector<1x8xf32>
    %cst_24 = arith.constant 5.000000e-01 : f32
    %43 = vector.broadcast %cst_24 : f32 to vector<1x8xf32>
    %44 = arith.cmpf ogt, %42, %43 : vector<1x8xf32>
    %cst_25 = arith.constant 0xFF800000 : f32
    %45 = vector.shape_cast %44 : vector<1x8xi1> to vector<1x8xi1>
    %46 = vector.broadcast %45 : vector<1x8xi1> to vector<8x8xi1>
    %47 = vector.broadcast %cst_25 : f32 to vector<8x8xf32>
    %48 = arith.select %46, %40, %47 : vector<8x8xi1>, vector<8x8xf32>
    %49 = tpu.iota {dimensions = array<i32: 0>} : vector<8x8xi32>
    %50 = tpu.iota {dimensions = array<i32: 1>} : vector<8x8xi32>
    %51 = vector.broadcast %4 : i32 to vector<8x8xi32>
    %52 = arith.addi %50, %51 : vector<8x8xi32>
    %53 = arith.cmpi ne, %49, %52 : vector<8x8xi32>
    %cst_26 = arith.constant 1.000000e+00 : f32
    %54 = vector.broadcast %cst_26 : f32 to vector<1x8xf32>
    %c0_27 = arith.constant 0 : index
    %c0_28 = arith.constant 0 : index
    %55 = vector.load %arg14[%c0_27, %c0_28] : memref<8x8xf32, #tpu.memory_space<vmem>>, vector<8x1xf32>
    %56 = vector.extract_strided_slice %48 {offsets = [0, 0], sizes = [1, 8], strides = [1, 1]} : vector<8x8xf32> to vector<1x8xf32>
    %57 = vector.broadcast %55 : vector<8x1xf32> to vector<8x8xf32>
    %58 = vector.broadcast %56 : vector<1x8xf32> to vector<8x8xf32>
    %59 = arith.addf %57, %58 : vector<8x8xf32>
    %cst_29 = arith.constant 0xFF800000 : f32
    %60 = vector.broadcast %cst_29 : f32 to vector<8x8xf32>
    %61 = arith.select %53, %59, %60 : vector<8x8xi1>, vector<8x8xf32>
    %62 = arith.maximumf %61, %35 : vector<8x8xf32>
    %63 = arith.minimumf %61, %35 : vector<8x8xf32>
    %64 = arith.subf %63, %62 : vector<8x8xf32>
    %65 = math.exp %64 : vector<8x8xf32>
    %cst_30 = arith.constant 1.000000e+00 : f32
    %66 = vector.broadcast %cst_30 : f32 to vector<8x8xf32>
    %67 = arith.addf %66, %65 : vector<8x8xf32>
    %68 = math.log %67 : vector<8x8xf32>
    %69 = arith.addf %62, %68 : vector<8x8xf32>
    %cst_31 = arith.constant dense<0.000000e+00> : vector<1x8xf32>
    %70 = tpu.matmul %54, %69, %cst_31 {dimension_numbers = #tpu.dot_dimension_numbers<[1], [0], [0], [1], [0, 0, 1, 1], [], []>} : vector<1x8xf32>, vector<8x8xf32>, vector<1x8xf32> -> vector<1x8xf32>
    %c0_32 = arith.constant 0 : index
    %c1 = arith.constant 1 : index
    %71 = vector.load %arg14[%c0_32, %c1] : memref<8x8xf32, #tpu.memory_space<vmem>>, vector<8x1xf32>
    %72 = vector.extract_strided_slice %48 {offsets = [1, 0], sizes = [1, 8], strides = [1, 1]} : vector<8x8xf32> to vector<1x8xf32>
    %73 = vector.broadcast %71 : vector<8x1xf32> to vector<8x8xf32>
    %74 = vector.broadcast %72 : vector<1x8xf32> to vector<8x8xf32>
    %75 = arith.addf %73, %74 : vector<8x8xf32>
    %cst_33 = arith.constant 0xFF800000 : f32
    %76 = vector.broadcast %cst_33 : f32 to vector<8x8xf32>
    %77 = arith.select %53, %75, %76 : vector<8x8xi1>, vector<8x8xf32>
    %78 = arith.maximumf %77, %35 : vector<8x8xf32>
    %79 = arith.minimumf %77, %35 : vector<8x8xf32>
    %80 = arith.subf %79, %78 : vector<8x8xf32>
    %81 = math.exp %80 : vector<8x8xf32>
    %cst_34 = arith.constant 1.000000e+00 : f32
    %82 = vector.broadcast %cst_34 : f32 to vector<8x8xf32>
    %83 = arith.addf %82, %81 : vector<8x8xf32>
    %84 = math.log %83 : vector<8x8xf32>
    %85 = arith.addf %78, %84 : vector<8x8xf32>
    %cst_35 = arith.constant dense<0.000000e+00> : vector<1x8xf32>
    %86 = tpu.matmul %54, %85, %cst_35 {dimension_numbers = #tpu.dot_dimension_numbers<[1], [0], [0], [1], [0, 0, 1, 1], [], []>} : vector<1x8xf32>, vector<8x8xf32>, vector<1x8xf32> -> vector<1x8xf32>
    %c0_36 = arith.constant 0 : index
    %c2 = arith.constant 2 : index
    %87 = vector.load %arg14[%c0_36, %c2] : memref<8x8xf32, #tpu.memory_space<vmem>>, vector<8x1xf32>
    %88 = vector.extract_strided_slice %48 {offsets = [2, 0], sizes = [1, 8], strides = [1, 1]} : vector<8x8xf32> to vector<1x8xf32>
    %89 = vector.broadcast %87 : vector<8x1xf32> to vector<8x8xf32>
    %90 = vector.broadcast %88 : vector<1x8xf32> to vector<8x8xf32>
    %91 = arith.addf %89, %90 : vector<8x8xf32>
    %cst_37 = arith.constant 0xFF800000 : f32
    %92 = vector.broadcast %cst_37 : f32 to vector<8x8xf32>
    %93 = arith.select %53, %91, %92 : vector<8x8xi1>, vector<8x8xf32>
    %94 = arith.maximumf %93, %35 : vector<8x8xf32>
    %95 = arith.minimumf %93, %35 : vector<8x8xf32>
    %96 = arith.subf %95, %94 : vector<8x8xf32>
    %97 = math.exp %96 : vector<8x8xf32>
    %cst_38 = arith.constant 1.000000e+00 : f32
    %98 = vector.broadcast %cst_38 : f32 to vector<8x8xf32>
    %99 = arith.addf %98, %97 : vector<8x8xf32>
    %100 = math.log %99 : vector<8x8xf32>
    %101 = arith.addf %94, %100 : vector<8x8xf32>
    %cst_39 = arith.constant dense<0.000000e+00> : vector<1x8xf32>
    %102 = tpu.matmul %54, %101, %cst_39 {dimension_numbers = #tpu.dot_dimension_numbers<[1], [0], [0], [1], [0, 0, 1, 1], [], []>} : vector<1x8xf32>, vector<8x8xf32>, vector<1x8xf32> -> vector<1x8xf32>
    %c0_40 = arith.constant 0 : index
    %c3 = arith.constant 3 : index
    %103 = vector.load %arg14[%c0_40, %c3] : memref<8x8xf32, #tpu.memory_space<vmem>>, vector<8x1xf32>
    %104 = vector.extract_strided_slice %48 {offsets = [3, 0], sizes = [1, 8], strides = [1, 1]} : vector<8x8xf32> to vector<1x8xf32>
    %105 = vector.broadcast %103 : vector<8x1xf32> to vector<8x8xf32>
    %106 = vector.broadcast %104 : vector<1x8xf32> to vector<8x8xf32>
    %107 = arith.addf %105, %106 : vector<8x8xf32>
    %cst_41 = arith.constant 0xFF800000 : f32
    %108 = vector.broadcast %cst_41 : f32 to vector<8x8xf32>
    %109 = arith.select %53, %107, %108 : vector<8x8xi1>, vector<8x8xf32>
    %110 = arith.maximumf %109, %35 : vector<8x8xf32>
    %111 = arith.minimumf %109, %35 : vector<8x8xf32>
    %112 = arith.subf %111, %110 : vector<8x8xf32>
    %113 = math.exp %112 : vector<8x8xf32>
    %cst_42 = arith.constant 1.000000e+00 : f32
    %114 = vector.broadcast %cst_42 : f32 to vector<8x8xf32>
    %115 = arith.addf %114, %113 : vector<8x8xf32>
    %116 = math.log %115 : vector<8x8xf32>
    %117 = arith.addf %110, %116 : vector<8x8xf32>
    %cst_43 = arith.constant dense<0.000000e+00> : vector<1x8xf32>
    %118 = tpu.matmul %54, %117, %cst_43 {dimension_numbers = #tpu.dot_dimension_numbers<[1], [0], [0], [1], [0, 0, 1, 1], [], []>} : vector<1x8xf32>, vector<8x8xf32>, vector<1x8xf32> -> vector<1x8xf32>
    %c0_44 = arith.constant 0 : index
    %c4 = arith.constant 4 : index
    %119 = vector.load %arg14[%c0_44, %c4] : memref<8x8xf32, #tpu.memory_space<vmem>>, vector<8x1xf32>
    %120 = vector.extract_strided_slice %48 {offsets = [4, 0], sizes = [1, 8], strides = [1, 1]} : vector<8x8xf32> to vector<1x8xf32>
    %121 = vector.broadcast %119 : vector<8x1xf32> to vector<8x8xf32>
    %122 = vector.broadcast %120 : vector<1x8xf32> to vector<8x8xf32>
    %123 = arith.addf %121, %122 : vector<8x8xf32>
    %cst_45 = arith.constant 0xFF800000 : f32
    %124 = vector.broadcast %cst_45 : f32 to vector<8x8xf32>
    %125 = arith.select %53, %123, %124 : vector<8x8xi1>, vector<8x8xf32>
    %126 = arith.maximumf %125, %35 : vector<8x8xf32>
    %127 = arith.minimumf %125, %35 : vector<8x8xf32>
    %128 = arith.subf %127, %126 : vector<8x8xf32>
    %129 = math.exp %128 : vector<8x8xf32>
    %cst_46 = arith.constant 1.000000e+00 : f32
    %130 = vector.broadcast %cst_46 : f32 to vector<8x8xf32>
    %131 = arith.addf %130, %129 : vector<8x8xf32>
    %132 = math.log %131 : vector<8x8xf32>
    %133 = arith.addf %126, %132 : vector<8x8xf32>
    %cst_47 = arith.constant dense<0.000000e+00> : vector<1x8xf32>
    %134 = tpu.matmul %54, %133, %cst_47 {dimension_numbers = #tpu.dot_dimension_numbers<[1], [0], [0], [1], [0, 0, 1, 1], [], []>} : vector<1x8xf32>, vector<8x8xf32>, vector<1x8xf32> -> vector<1x8xf32>
    %c0_48 = arith.constant 0 : index
    %c5 = arith.constant 5 : index
    %135 = vector.load %arg14[%c0_48, %c5] : memref<8x8xf32, #tpu.memory_space<vmem>>, vector<8x1xf32>
    %136 = vector.extract_strided_slice %48 {offsets = [5, 0], sizes = [1, 8], strides = [1, 1]} : vector<8x8xf32> to vector<1x8xf32>
    %137 = vector.broadcast %135 : vector<8x1xf32> to vector<8x8xf32>
    %138 = vector.broadcast %136 : vector<1x8xf32> to vector<8x8xf32>
    %139 = arith.addf %137, %138 : vector<8x8xf32>
    %cst_49 = arith.constant 0xFF800000 : f32
    %140 = vector.broadcast %cst_49 : f32 to vector<8x8xf32>
    %141 = arith.select %53, %139, %140 : vector<8x8xi1>, vector<8x8xf32>
    %142 = arith.maximumf %141, %35 : vector<8x8xf32>
    %143 = arith.minimumf %141, %35 : vector<8x8xf32>
    %144 = arith.subf %143, %142 : vector<8x8xf32>
    %145 = math.exp %144 : vector<8x8xf32>
    %cst_50 = arith.constant 1.000000e+00 : f32
    %146 = vector.broadcast %cst_50 : f32 to vector<8x8xf32>
    %147 = arith.addf %146, %145 : vector<8x8xf32>
    %148 = math.log %147 : vector<8x8xf32>
    %149 = arith.addf %142, %148 : vector<8x8xf32>
    %cst_51 = arith.constant dense<0.000000e+00> : vector<1x8xf32>
    %150 = tpu.matmul %54, %149, %cst_51 {dimension_numbers = #tpu.dot_dimension_numbers<[1], [0], [0], [1], [0, 0, 1, 1], [], []>} : vector<1x8xf32>, vector<8x8xf32>, vector<1x8xf32> -> vector<1x8xf32>
    %c0_52 = arith.constant 0 : index
    %c6 = arith.constant 6 : index
    %151 = vector.load %arg14[%c0_52, %c6] : memref<8x8xf32, #tpu.memory_space<vmem>>, vector<8x1xf32>
    %152 = vector.extract_strided_slice %48 {offsets = [6, 0], sizes = [1, 8], strides = [1, 1]} : vector<8x8xf32> to vector<1x8xf32>
    %153 = vector.broadcast %151 : vector<8x1xf32> to vector<8x8xf32>
    %154 = vector.broadcast %152 : vector<1x8xf32> to vector<8x8xf32>
    %155 = arith.addf %153, %154 : vector<8x8xf32>
    %cst_53 = arith.constant 0xFF800000 : f32
    %156 = vector.broadcast %cst_53 : f32 to vector<8x8xf32>
    %157 = arith.select %53, %155, %156 : vector<8x8xi1>, vector<8x8xf32>
    %158 = arith.maximumf %157, %35 : vector<8x8xf32>
    %159 = arith.minimumf %157, %35 : vector<8x8xf32>
    %160 = arith.subf %159, %158 : vector<8x8xf32>
    %161 = math.exp %160 : vector<8x8xf32>
    %cst_54 = arith.constant 1.000000e+00 : f32
    %162 = vector.broadcast %cst_54 : f32 to vector<8x8xf32>
    %163 = arith.addf %162, %161 : vector<8x8xf32>
    %164 = math.log %163 : vector<8x8xf32>
    %165 = arith.addf %158, %164 : vector<8x8xf32>
    %cst_55 = arith.constant dense<0.000000e+00> : vector<1x8xf32>
    %166 = tpu.matmul %54, %165, %cst_55 {dimension_numbers = #tpu.dot_dimension_numbers<[1], [0], [0], [1], [0, 0, 1, 1], [], []>} : vector<1x8xf32>, vector<8x8xf32>, vector<1x8xf32> -> vector<1x8xf32>
    %c0_56 = arith.constant 0 : index
    %c7 = arith.constant 7 : index
    %167 = vector.load %arg14[%c0_56, %c7] : memref<8x8xf32, #tpu.memory_space<vmem>>, vector<8x1xf32>
    %168 = vector.extract_strided_slice %48 {offsets = [7, 0], sizes = [1, 8], strides = [1, 1]} : vector<8x8xf32> to vector<1x8xf32>
    %169 = vector.broadcast %167 : vector<8x1xf32> to vector<8x8xf32>
    %170 = vector.broadcast %168 : vector<1x8xf32> to vector<8x8xf32>
    %171 = arith.addf %169, %170 : vector<8x8xf32>
    %cst_57 = arith.constant 0xFF800000 : f32
    %172 = vector.broadcast %cst_57 : f32 to vector<8x8xf32>
    %173 = arith.select %53, %171, %172 : vector<8x8xi1>, vector<8x8xf32>
    %174 = arith.maximumf %173, %35 : vector<8x8xf32>
    %175 = arith.minimumf %173, %35 : vector<8x8xf32>
    %176 = arith.subf %175, %174 : vector<8x8xf32>
    %177 = math.exp %176 : vector<8x8xf32>
    %cst_58 = arith.constant 1.000000e+00 : f32
    %178 = vector.broadcast %cst_58 : f32 to vector<8x8xf32>
    %179 = arith.addf %178, %177 : vector<8x8xf32>
    %180 = math.log %179 : vector<8x8xf32>
    %181 = arith.addf %174, %180 : vector<8x8xf32>
    %cst_59 = arith.constant dense<0.000000e+00> : vector<1x8xf32>
    %182 = tpu.matmul %54, %181, %cst_59 {dimension_numbers = #tpu.dot_dimension_numbers<[1], [0], [0], [1], [0, 0, 1, 1], [], []>} : vector<1x8xf32>, vector<8x8xf32>, vector<1x8xf32> -> vector<1x8xf32>
    %183 = tpu.concatenate %70, %86, %102, %118, %134, %150, %166, %182 in 0 : vector<1x8xf32>, vector<1x8xf32>, vector<1x8xf32>, vector<1x8xf32>, vector<1x8xf32>, vector<1x8xf32>, vector<1x8xf32>, vector<1x8xf32> -> vector<8x8xf32>
    %c0_60 = arith.constant 0 : index
    %c0_61 = arith.constant 0 : index
    %c0_62 = arith.constant 0 : index
    %184 = vector.load %arg11[%c0_60, %c0_61, %c0_62] : memref<1x8x8xf32, #tpu.memory_space<vmem>>, vector<1x8x8xf32>
    %185 = vector.shape_cast %184 : vector<1x8x8xf32> to vector<8x8xf32>
    %186 = vector.shape_cast %183 : vector<8x8xf32> to vector<1x8x8xf32>
    tpu.vector_store %arg11[%c0_60, %c0_61, %c0_62], %186 {strides = array<i32>} : memref<1x8x8xf32, #tpu.memory_space<vmem>>, vector<1x8x8xf32>,
    return
  }
  func.func @transform_0(%arg0: i32, %arg1: i32) -> (i32, i32, i32) {
    %c0_i32 = arith.constant 0 : i32
    %c0_i32_0 = arith.constant 0 : i32
    %c0_i32_1 = arith.constant 0 : i32
    return %arg0, %c0_i32, %c0_i32_0 : i32, i32, i32
  }
  func.func @transform_1(%arg0: i32, %arg1: i32) -> (i32, i32, i32) {
    %c0_i32 = arith.constant 0 : i32
    %c0_i32_0 = arith.constant 0 : i32
    %c0_i32_1 = arith.constant 0 : i32
    return %arg0, %c0_i32, %c0_i32_0 : i32, i32, i32
  }
  func.func @transform_2(%arg0: i32, %arg1: i32) -> (i32, i32, i32) {
    %c0_i32 = arith.constant 0 : i32
    %c0_i32_0 = arith.constant 0 : i32
    return %arg0, %c0_i32, %arg1 : i32, i32, i32
  }
  func.func @transform_3(%arg0: i32, %arg1: i32) -> (i32, i32, i32) {
    %c0_i32 = arith.constant 0 : i32
    %c0_i32_0 = arith.constant 0 : i32
    %c0_i32_1 = arith.constant 0 : i32
    return %arg0, %c0_i32, %c0_i32_0 : i32, i32, i32
  }
  func.func @transform_4(%arg0: i32, %arg1: i32) -> (i32, i32) {
    %c0_i32 = arith.constant 0 : i32
    %c0_i32_0 = arith.constant 0 : i32
    %c0_i32_1 = arith.constant 0 : i32
    return %c0_i32, %c0_i32_0 : i32, i32
  }
  func.func @transform_5(%arg0: i32, %arg1: i32) -> (i32, i32) {
    %c0_i32 = arith.constant 0 : i32
    %c0_i32_0 = arith.constant 0 : i32
    %c0_i32_1 = arith.constant 0 : i32
    return %c0_i32, %c0_i32_0 : i32, i32
  }
  func.func @transform_6(%arg0: i32, %arg1: i32) -> (i32, i32) {
    %c0_i32 = arith.constant 0 : i32
    %c0_i32_0 = arith.constant 0 : i32
    %c0_i32_1 = arith.constant 0 : i32
    return %c0_i32, %c0_i32_0 : i32, i32
  }
  func.func @transform_7(%arg0: i32, %arg1: i32) -> (i32, i32, i32) {
    %c0_i32 = arith.constant 0 : i32
    %c0_i32_0 = arith.constant 0 : i32
    %c0_i32_1 = arith.constant 0 : i32
    return %arg0, %c0_i32, %c0_i32_0 : i32, i32, i32
  }
  func.func @transform_8(%arg0: i32, %arg1: i32) -> (i32, i32, i32) {
    %c0_i32 = arith.constant 0 : i32
    %c0_i32_0 = arith.constant 0 : i32
    return %arg0, %c0_i32, %arg1 : i32, i32, i32
  }
  func.func @transform_9(%arg0: i32, %arg1: i32) -> (i32, i32, i32) {
    %c0_i32 = arith.constant 0 : i32
    %c0_i32_0 = arith.constant 0 : i32
    return %arg0, %c0_i32, %arg1 : i32, i32, i32
  }
}

</mosaic_0001>

<bundles_post_ra>
// kernel: tpu_custom_call.1
= control target key start
LH: loop header
LB: loop body
LE: loop exit
PB: predicated region body
PF: predicated region fallthrough
CT: control target
= control target key end

     0   :  { %s2011_s0 = inlined_call_operand.vmem [shape: f32[2,8,32], index: 0, kind: input, shape index: {}]   ;;  %s2012_s1 = inlined_call_operand.hbm [shape: f32[2,8,32], index: 1, kind: input, shape index: {}]   ;;  %s2013_s2 = inlined_call_operand.vmem [shape: f32[2,1,8], index: 2, kind: input, shape index: {}]   ;;  %s2014_s3 = inlined_call_operand.vmem [shape: f32[2,8,1], index: 3, kind: input, shape index: {}]   ;;  %s2015_s4 = inlined_call_operand.vmem [shape: f32[32,128], index: 4, kind: input, shape index: {}]   ;;  %s2016_s5 = inlined_call_operand.vmem [shape: f32[32,8], index: 5, kind: input, shape index: {}]   ;;  %s2017_s6 = inlined_call_operand.hbm [shape: f32[8,32], index: 6, kind: input, shape index: {}]   ;;  %s2018_s7 = inlined_call_operand.hbm [shape: f32[2,8,128], index: 7, kind: output, shape index: {0}]   ;;  %s2019_s8 = inlined_call_operand.hbm [shape: f32[2,8,8], index: 8, kind: output, shape index: {1}]   ;;  %s2020_s9 = inlined_call_operand.hbm [shape: f32[2,8,8], index: 9, kind: output, shape index: {2}]  }
   0x1   :  { %2027 = sst [smem:[#allocation20_spill]] %s2011_s0 }
   0x2   :  { %2028 = sst [smem:[#allocation21_spill]] %s2012_s1 }
   0x3   :  { %2029 = sst [smem:[#allocation22_spill]] %s2017_s6 }
   0x4   :  { %2030 = sst [smem:[#allocation23_spill]] %s2018_s7 }
   0x5   :  { %2031 = sst [smem:[#allocation24_spill]] %s2020_s9 }
   0x6   :  { %15 = vsyncpa [#allocation6], 0 }
   0x7   :  { %17 = vsyncpa [#allocation6 + $0x1], 0 }
   0x8   :  { %18 = vsyncpa [#allocation9], 0 }
   0x9   :  { %19 = vsyncpa [#allocation7], 0 }
   0xa   :  { %21 = vsyncpa [#allocation7 + $0x1], 0 }
   0xb   :  { %22 = vsyncpa [#allocation12], 0 }
   0xc   :  { %24 = vsyncpa [#allocation12 + $0x1], 0  ;;  %s1689_s30 = smov 0   ;;  %s1691_s10 = smov 0  }
   0xd   :  { %s1693_s11 = smov 0   ;;  %s1695_s12 = smov 0  }
   0xe   :  { %s1697_s13 = smov 0   ;;  %s1699_s14 = smov 0  }
   0xf LB: > { %2032 = sst [smem:[#allocation18_spill]] %s1607_s30  ;;  %s1720_s15 = sadd.s32 4294967295, %s1627_s14   ;;  %s1627_s14 = sphi %s1699_s14, %s30_s14   ;;  %s1623_s13 = sphi %s1697_s13, %s2056_s13   ;;  %s1619_s12 = sphi %s1695_s12, %s2055_s12   ;;  %s1615_s11 = sphi %s1693_s11, %s2054_s11   ;;  %s1611_s10 = sphi %s1691_s10, %s2053_s10   ;;  %s1607_s30 = sphi %s1689_s30, %s2052_s30  }
  0x10   : > { %s2021_s16 = sadd.s32 4294967294, %s1627_s14   ;;  %p88_p0 = scmp.ne.s32.totalorder %s1611_s10, %s1607_s30 }
  0x11   : > { %p89_p1 = scmp.eq.s32.totalorder %s1720_s15, 0  ;;  %p229_p2 = scmp.eq.s32.totalorder %s1720_s15, 1 }
  0x12   : > { %p235_p3 = scmp.eq.s32.totalorder %s2021_s16, 1  ;;  %p1250_p5 = scmp.ge.s32.totalorder %s1627_s14, 1 }
  0x13   : > { %p1731_p4 = por %p89_p1, %p88_p0  ;;  %p298_p7 = scmp.lt.s32.totalorder %s1627_s14, 3 }
  0x14   : > { %p1736_p6 = por %p235_p3, %p88_p0  ;;  %s2036_s6 = sld [smem:[#allocation22_spill]] }
  0x15   : > { %p1744_p8 = pnand %p1250_p5, %p298_p7  ;;  %p1252_p9 = scmp.ge.s32.totalorder %s1627_s14, 2 }
  0x16   : > { %s2034_s18 = scalar_select %p1736_p6, 1, 0 }
  0x17   : > { %p1295_p10 = pneg %p1744_p8  ;;  %s1629_s23 = smov [#allocation8]  }
  0x18   : > { %2035 = sst [smem:[#allocation19_spill]] %s2034_s18  ;;  %s318_s24 = sshll.u32 %s1629_s23, 4  ;;  %s319_s24 = int_to_ptr.vmem [resolvable:$true] %s318_s24 }
  0x19   : > { %p1296_p11 = pnand %p1295_p10, %p89_p1  ;;  %s42_s25 = sadd.s32 1, %s1623_s13 }
  0x1a   : > { %s316_s21 = sshll.u32 %s2036_s6, 4  ;;  %p44_p12 = scmp.ge.s32.totalorder %s42_s25, 2  ;;  %s317_s21 = int_to_ptr.hbm [resolvable:$true] %s316_s21 }
  0x1b   : > { %1298 = dma.hbm_to_vmem [thread:$0]  (!%p1296_p11), %s317_s21, 128, %s319_s24, [#allocation9]  }
  0x1c   : > { %s75_s26 = sadd.s32 1, %s1615_s11  ;;  %p82_p13 = scmp.ne.s32.totalorder %s1615_s11, %s1611_s10 }
  0x1d   : > { %p83_p0 = scmp.eq.s32.totalorder %s1627_s14, 0  ;;  %s2058_s25 = smov (%p44_p12, %s42_s25), 0 }
  0x1e   : > { %p1766_p5 = por %p229_p2, %p82_p13  ;;  %s72_s29 = ssub.s32 %s1623_s13, %s2058_s25 }
  0x1f   : > { %p1760_p3 = por %p83_p0, %p82_p13  ;;  %p1314_p7 = scmp.lt.s32.totalorder %s1627_s14, 2 }
  0x20   : > { %p73_p10 = scmp.eq.s32.totalorder %s72_s29, 0  ;;  %s336_s19 = sand.u32 1, %s1615_s11  }
  0x21   : > { %s1253_s20 = sshll.u32 %s336_s19, 3  ;;  %s1254_s23 = sshll.u32 %s1623_s13, 3 }
  0x22   : > { %s1775_s21 = scalar_select %p73_p10, %s1615_s11, %s75_s26  }
  0x23   : > { %s2040_s1 = sld [smem:[#allocation21_spill]]  ;;  %s340_s18 = scalar_lea.vmem [#allocation5], %s1253_s20 }
  0x24   : > { %s348_s30 = sshll.u32 %s340_s18, 4  ;;  %p1300_p2 = pnand %p1314_p7, %p1760_p3  ;;  %s349_s30 = int_to_ptr.vmem [resolvable:$true] %s348_s30 }
  0x25   : > { %s337_s7 = scalar_lea.sflag [#allocation6], %s336_s19  ;;  %s1786_s26 = sand.u32 (!%p1744_p8), 1, %s1611_s10  }
  0x26   : > { %s1789_s16 = sshll.u32 (!%p1744_p8), %s1786_s26, 3  ;;  %s376_s18 = scalar_lea.sflag (!%p1744_p8), [#allocation6], %s1786_s26 }
  0x27   : > { %373 = sbr.rel (%p1744_p8) target bundleno = 668 (0x29c), region = 48 }
  0x29   : > { %s344_s6 = scalar_lea.hbm %s2040_s1, %s1254_s23 }
  0x2a   : > { %s346_s9 = sshll.u32 %s344_s6, 4  ;;  %s347_s9 = int_to_ptr.hbm [resolvable:$true] %s346_s9 }
  0x2b   : > { %1302 = dma.hbm_to_vmem [thread:$0]  (!%p1300_p2), %s347_s9, 128, %s349_s30, %s337_s7  }
  0x2c   : > { %1590 = dma.done.wait (%p1731_p4), %s376_s18, 128  }
  0x2d   : > { %1592 = vsyncadd (%p1731_p4), %s376_s18, 4294967168 }
  0x2e   : > { %1594 = dma.done.wait (%p89_p1), [#allocation9], 128  }
  0x2f   : > { %1596 = vsyncadd (%p89_p1), [#allocation9], 4294967168  ;;  %p444_p8 = scmp.lt.s32.totalorder %s1619_s12, 1  ;;  %v1630_v0 = vmov 0   ;;  %v466_v1 = vld [vmem:[%s2015_s4 + $0x18] sm:$0xff]  ;;  %v465_v2 = vld [vmem:[%s2015_s4 + $0x10] sm:$0xff] }
  0x30   : > { %1376 = vset.pattern.permute.xlu1 %v1630_v0  ;;  %1375 = vset.pattern.permute.xlu0 %v1630_v0  ;;  %v502_v3 = vld [vmem:[%s2016_s5 + $0x18] sm:$0xff]  ;;  %v464_v4 = vld [vmem:[%s2015_s4 + $0x8] sm:$0xff]  ;;  %s2041_s0 = sld [smem:[#allocation20_spill]]  ;;  %v501_v5 = vld [vmem:[%s2016_s5 + $0x10] sm:$0xff]  ;;  %vm467_vm1 = vcmask 261120   ;;  %vm534_vm3 = vcmask 64512  }
  0x31   : > { %s1805_s7 = scalar_select %p444_p8, %s1619_s12, 1  ;;  %483 = vmatpush.msra.mxu0 %v466_v1  ;;  %518 = vmatpush.msra.mxu1 %v502_v3  ;;  %v500_v6 = vld [vmem:[%s2016_s5 + $0x8] sm:$0xff]  ;;  %v463_v8 = vld [vmem:[%s2015_s4] sm:$0xff]  ;;  %v1631_v18 = vmov 1.0   ;;  %v1632_v21 = vmov 3   ;;  %v1633_v22 = vmov 2   ;;  %v663_v3 = vlaneseq }
  0x32   : > { %v499_v10 = vld [vmem:[%s2016_s5] sm:$0xff]  ;;  %1377 = vset.pattern.permute.xlu2 %v1632_v21  ;;  %v1634_v23 = vmov 1   ;;  %vm496_vm4 = vcmask 7168   ;;  %v1635_v25 = vmov 7   ;;  %v1636_v26 = vmov 4   ;;  %s436_s18 = scalar_lea.vmem [#allocation11], %s1789_s16 }
  0x33   : > { %s1261_s9 = sshll.u32 %s1805_s7, 3  ;;  %484 = vmatpush.msra.mxu0 %v465_v2  ;;  %519 = vmatpush.msra.mxu1 %v501_v5  ;;  %v629_v20 = vld [vmem:[#allocation8] sm:$0xff]  ;;  %v1637_v28 = vmov 6   ;;  %v1638_v29 = vmov 5   ;;  %s453_s22 = scalar_lea.vmem %s2013_s2, %s1805_s7 }
  0x34   : > { %s457_s20 = scalar_lea.vmem %s2014_s3, %s1261_s9  ;;  %v657_v53 = vld [vmem:[%s453_s22] sm:$0x1]  ;;  %s1930_s7 = sshll.u32 %s1619_s12, 3 }
  0x35   : > { %v526_v7 = vld [vmem:[%s457_s20] sm:$0xff]  ;;  %485 = vmatpush.msra.mxu0 %v464_v4  ;;  %520 = vmatpush.msra.mxu1 %v500_v6  ;;  %s2026_s20 = scalar_lea.vmem [#allocation10], %s1789_s16  ;;  %vm658_vm5 = vcmp.gt.f32.partialorder %v657_v53, 0.5  ;;  %v664_v6 = vshrl.u32 %v663_v3, 7  ;;  %s1035_s19 = scalar_lea.hbm %s2019_s8, %s1930_s7 }
  0x36   : > { %s447_s17 = scalar_lea.vmem %s2041_s0, %s1261_s9  ;;  %vm527_vm0 = vcmp.gt.f32.partialorder %v526_v7, 0.5  ;;  %s2042_s9 = scalar_lea.vmem [#allocation5], %s1789_s16  ;;  %v659_v59 = vsel %vm658_vm5, 1, %v1630_v0 }
  0x37   : > { %v462_v9 = vld [vmem:[%s447_s17] sm:$0xff]  ;;  %v528_v11 = vsel %vm527_vm0, 1, %v1630_v0  ;;  %v498_v12 = vld [vmem:[%s2042_s9] sm:$0xff]  ;;  %486 = vmatpush.msra.mxu0 %v463_v8  ;;  %521 = vmatpush.msra.mxu1 %v499_v10  ;;  %v660_v61 = vperm.slane %v659_v59, 0  ;;  %v666_v8 = vand.u32 127, %v663_v3  ;;  %s1004_s23 = sand.u32 1, %s1720_s15  }
  0x38   : > { %530 = vperm.xlu1 %1376, %v528_v11   ;;  %1263 = vmatmul.msk.f32.vlgmr.msra.gmra.mxu0 %vm467_vm1, %v462_v9  ;;  %s1037_s24 = sshll.u32 %s436_s18, 4  ;;  %s1039_s1 = sshll.u32 %s1035_s19, 4  ;;  %s1038_s24 = int_to_ptr.vmem [resolvable:$true] %s1037_s24  ;;  %s1040_s1 = int_to_ptr.hbm [resolvable:$true] %s1039_s1 }
  0x39   : > { %1264 = vmatmul.msk.f32.vlgmr.msra.gmra.mxu1 %vm467_vm1, %v498_v12  ;;  %vm661_vm6 = vcmp.eq.s32.totalorder %v660_v61, 1  ;;  %vm1861_vm8 = vcmp.ne.s32.totalorder %v664_v6, %v666_v8  ;;  %s2045_s30 = sld [smem:[#allocation23_spill]]  ;;  %s1495_s12 = sshra.s32 %s1040_s1, 4  ;;  %s1496_s12 = int_to_ptr.hbm [resolvable:$true] %s1495_s12 }
  0x3a   : > { %s1497_s0 = scalar_lea.hbm %s1496_s12, 8  ;;  %p1502_p12 = scmp.lt.s32.totalorder %s1496_s12, %s2019_s8 }
  0x3b   : > { %p1498_p1 = scmp.ne.s32.totalorder %s1496_s12, %s1497_s0 }
  0x3d   : > { %p1499_p4 = pnand %p1498_p1, %p1766_p5 }
  0x3f   : > { %s2046_s17 = smov %s2045_s30  ;;  %s1020_s22 = scalar_lea.hbm %s2045_s30, %s1930_s7 }
  0x40   : > { %p1500_p11 = pneg %p1499_p4 }
  0xaa   : > { %v531_v13 = vpop.permute.xlu1 %530 }
  0xab   : > { %vm532_vm2 = vcmp.eq.s32.totalorder %v531_v13, 1 }
  0xb5   : > { %v488_v14 = vpop.f32.mrf.mxu0 }
  0xb6   : > { %576 = vmatpush.xpose.msra.mxu3 %v488_v14  ;;  %v493_v15 = vmul.f32 %v488_v14, %v488_v14  ;;  %v523_v16 = vpop.f32.mrf.mxu1  ;;  %492 = vst [vmem:[%s2026_s20] sm:$0xff] %v488_v14  ;;  %s1943_s20 = scalar_lea.sflag [#allocation12], %s1004_s23 }
  0xb7   : > { %v533_v17 = vsel %vm532_vm2, %v523_v16, -inf }
  0xb8   : > { %494 = vadd.xlane.f32.xlu0 %v493_v15  ;;  %556 = vmatpush.xpose.msra.mxu2 %v493_v15  ;;  %535 = vst.msk [vmem:[#allocation4] sm:$0xff] %vm534_vm3, %v533_v17 }
  0xb9   : > { %577 = vmatmul.f32.vlgmr.msra.gmra.mxu3 %v488_v14 }
  0xbb   : > { %557 = vmatmul.f32.vlgmr.msra.gmra.mxu2 %v1631_v18 }
  0xbc   : > { %1265 = vmatpush.xpose.msk.msrb.mxu2 %vm467_vm1, %v498_v12 }
  0xbf   : > { %v670_v19 = vld [vmem:[#allocation4] sm:$0xff] }
  0xc0   : > { %673 = vperm.xlu1 %1376, %v670_v19   ;;  %784 = vperm.xlu2 %1377, %v670_v19  }
  0xc3   : > { %1266 = vmatmul.msk.f32.vlgmr.msrb.gmra.mxu2 %vm467_vm1, %v629_v20 }
  0xc8   : > { %1379 = vset.pattern.permute.xlu1 %v1633_v22  ;;  %1378 = vset.pattern.permute.xlu2 %v1634_v23 }
  0xc9   : > { %748 = vperm.xlu1 %1379, %v670_v19   ;;  %712 = vperm.xlu2 %1378, %v670_v19  }
  0xd1   : > { %1381 = vset.pattern.permute.xlu1 %v1635_v25  ;;  %1380 = vset.pattern.permute.xlu2 %v1636_v26 }
  0xd2   : > { %928 = vperm.xlu1 %1381, %v670_v19   ;;  %820 = vperm.xlu2 %1380, %v670_v19  }
  0xda   : > { %1383 = vset.pattern.permute.xlu1 %v1637_v28  ;;  %1382 = vset.pattern.permute.xlu2 %v1638_v29 }
  0xdb   : > { %892 = vperm.xlu1 %1383, %v670_v19   ;;  %856 = vperm.xlu2 %1382, %v670_v19  }
 0x11a   : > { %v785_v48 = vpop.permute.xlu2 %784 }
 0x123   : > { %v713_v55 = vpop.permute.xlu2 %712 }
 0x12b   : > { %v495_v24 = vpop.xlane.xlu0 %494 }
 0x12c   : > { %497 = vst.msk [vmem:[#allocation3] sm:$0xff] %vm496_vm4, %v495_v24  ;;  %v821_v63 = vpop.permute.xlu2 %820 }
 0x132   : > { %v674_v49 = vpop.permute.xlu1 %673 }
 0x133   : > { %v581_v27 = vld [vmem:[#allocation3] sm:$0xff] }
 0x134   : > { %584 = vperm.xlu0 %1375, %v581_v27  }
 0x135   : > { %v857_v15 = vpop.permute.xlu2 %856 }
 0x13b   : > { %v749_v56 = vpop.permute.xlu1 %748 }
 0x13c   : > { %1384 = vset.pattern.permute.xlu0 %v1635_v25  ;;  %v578_v32 = vpop.f32.mrf.mxu3 }
 0x13d   : > { %v589_v34 = vmul.f32 2.0, %v578_v32 }
 0x13e   : > { %v558_v30 = vpop.f32.mrf.mxu2 }
 0x13f   : > { %v587_v31 = vperm.slane %v558_v30, 0 }
 0x144   : > { %v929_v1 = vpop.permute.xlu1 %928 }
 0x146   : > { %v654_v2 = vpop.f32.mrf.mxu2 }
 0x147   : > { %v662_v4 = vsel %vm661_vm6, %v654_v2, -inf }
 0x148   : > { %v676_v9 = vperm.slane %v662_v4, 0  ;;  %v787_v10 = vperm.slane %v662_v4, 3  ;;  %v715_v11 = vperm.slane %v662_v4, 1  ;;  %v823_v13 = vperm.slane %v662_v4, 4 }
 0x149   : > { %v859_v0 = vperm.slane %v662_v4, 5  ;;  %v751_v16 = vperm.slane %v662_v4, 2  ;;  %v931_v17 = vperm.slane %v662_v4, 7  ;;  %v895_v19 = vperm.slane %v662_v4, 6 }
 0x14a   : > { %v677_v24 = vadd.f32 %v676_v9, %v674_v49  ;;  %v788_v25 = vadd.f32 %v787_v10, %v785_v48  ;;  %v716_v26 = vadd.f32 %v715_v11, %v713_v55  ;;  %v824_v28 = vadd.f32 %v823_v13, %v821_v63 }
 0x14b   : > { %v860_v29 = vadd.f32 %v859_v0, %v857_v15  ;;  %v932_v32 = vadd.f32 %v931_v17, %v929_v1 }
 0x14d   : > { %v893_v22 = vpop.permute.xlu1 %892 }
 0x1a6   : > { %v585_v33 = vpop.permute.xlu0 %584 }
 0x1a7   : > { %v588_v35 = vadd.f32 %v587_v31, %v585_v33  ;;  %v752_v31 = vadd.f32 %v751_v16, %v749_v56  ;;  %v896_v33 = vadd.f32 %v895_v19, %v893_v22 }
 0x1a9   : > { %v590_v36 = vsub.f32 %v588_v35, %v589_v34  ;;  %v678_v35 = vsel %vm1861_vm8, %v677_v24, -inf }
 0x1ab   : > { %v591_v37 = vmax.f32 %v590_v36, 0.0 }
 0x1ad   : > { %v594_v38 = vsub.f32 0.0, %v591_v37  ;;  %593 = vst.msk [vmem:[%s436_s18] sm:$0xff] %vm534_vm3, %v591_v37  ;;  %s1501_s18 = scalar_lea.hbm %s2019_s8, 16 }
 0x1ae   : > { %p1503_p13 = scmp.lt.s32.totalorder %s1501_s18, %s1497_s0 }
 0x1af   : > { %v595_v39 = vsel %vm534_vm3, %v594_v38, -inf }
 0x1b0   : > { %v596_v40 = vrot.slane %v595_v39, 4  ;;  %p1504_p0 = por %p1503_p13, %p1502_p12 }
 0x1b2   : > { %v597_v41 = vmax.f32 %v595_v39, %v596_v40  ;;  %v717_v39 = vsel %vm1861_vm8, %v716_v26, -inf  ;;  %v825_v40 = vsel %vm1861_vm8, %v824_v28, -inf  ;;  %p1505_p3 = pnand %p1504_p0, %p1500_p11 }
 0x1b4   : > { %v598_v42 = vrot.slane %v597_v41, 2 }
 0x1b6   : > { %v599_v43 = vmax.f32 %v597_v41, %v598_v42  ;;  %v861_v41 = vsel %vm1861_vm8, %v860_v29, -inf  ;;  %v753_v42 = vsel %vm1861_vm8, %v752_v31, -inf }
 0x1b8   : > { %v600_v44 = vrot.slane %v599_v43, 1 }
 0x1ba   : > { %v601_v45 = vmax.f32 %v599_v43, %v600_v44  ;;  %v933_v43 = vsel %vm1861_vm8, %v932_v32, -inf  ;;  %v897_v44 = vsel %vm1861_vm8, %v896_v33, -inf }
 0x1bc   : > { %v602_v46 = vsub.f32 %v594_v38, %v601_v45  ;;  %v789_v38 = vsel %vm1861_vm8, %v788_v25, -inf }
 0x1be   : > { %v603_v47 = vmul.f32 1.442695, %v602_v46 }
 0x1c0   : > { %1385 = vpow2.f32 %v603_v47 }
 0x1c6   : > { %v1386_v50 = vpop.eup %1385 }
 0x1c7   : > { %v605_v51 = vsel %vm534_vm3, %v1386_v50, 0.0 }
 0x1c8   : > { %v606_v52 = vrot.slane %v605_v51, 4 }
 0x1ca   : > { %v607_v54 = vadd.f32 %v606_v52, %v605_v51 }
 0x1cc   : > { %v608_v57 = vrot.slane %v607_v54, 2 }
 0x1ce   : > { %v609_v58 = vadd.f32 %v608_v57, %v607_v54 }
 0x1d0   : > { %v610_v60 = vrot.slane %v609_v58, 1 }
 0x1d2   : > { %v611_v62 = vadd.f32 %v610_v60, %v609_v58 }
 0x1d4   : > { %1387 = vrcp.f32 %v611_v62  ;;  %v623_v14 = vand.u32 2147483648, %v611_v62  ;;  %v621_v21 = vand.u32 2147483647, %v611_v62  ;;  %vm617_vm9 = vweird.f32 %v611_v62 }
 0x1d6   : > { %v624_v30 = vor.u32 1.1754944e-38, %v623_v14  ;;  %vm622_vm11 = vcmp.eq.f32.partialorder %v621_v21, 8.507059e+37 }
 0x1da   : > { %v1388_v5 = vpop.eup %1387 }
 0x1db   : > { %v613_v7 = vmul.f32 %v1388_v5, %v611_v62  ;;  %vm618_vm7 = vweird.f32 %v1388_v5 }
 0x1dc   : > { %vm619_vm10 = vmor %vm617_vm9, %vm618_vm7 }
 0x1dd   : > { %v614_v12 = vsub.f32 1.0, %v613_v7 }
 0x1df   : > { %v615_v20 = vmul.f32 %v1388_v5, %v614_v12 }
 0x1e1   : > { %v616_v27 = vadd.f32 %v1388_v5, %v615_v20 }
 0x1e3   : > { %v620_v34 = vsel %vm619_vm10, %v1388_v5, %v616_v27 }
 0x1e4   : > { %v625_v36 = vsel %vm622_vm11, %v624_v30, %v620_v34 }
 0x1e5   : > { %v626_v37 = vmul.f32 %v1386_v50, %v625_v36 }
 0x1e7   : > { %v1881_v45 = vmax.f32 %v789_v38, %v626_v37  ;;  %v791_v46 = vmin.f32 %v789_v38, %v626_v37  ;;  %v719_v47 = vmin.f32 %v717_v39, %v626_v37  ;;  %v1883_v48 = vmax.f32 %v825_v40, %v626_v37 }
 0x1e8   : > { %v827_v49 = vmin.f32 %v825_v40, %v626_v37  ;;  %v1885_v50 = vmax.f32 %v861_v41, %v626_v37  ;;  %v863_v51 = vmin.f32 %v861_v41, %v626_v37  ;;  %v755_v52 = vmin.f32 %v753_v42, %v626_v37 }
 0x1e9   : > { %v792_v53 = vsub.f32 %v791_v46, %v1881_v45  ;;  %v1888_v54 = vmax.f32 %v933_v43, %v626_v37  ;;  %v935_v55 = vmin.f32 %v933_v43, %v626_v37  ;;  %v1890_v56 = vmax.f32 %v897_v44, %v626_v37 }
 0x1ea   : > { %v828_v57 = vsub.f32 %v827_v49, %v1883_v48  ;;  %v864_v58 = vsub.f32 %v863_v51, %v1885_v50  ;;  %v899_v59 = vmin.f32 %v897_v44, %v626_v37  ;;  %v1894_v60 = vmax.f32 %v678_v35, %v626_v37 }
 0x1eb   : > { %v793_v61 = vmul.f32 1.442695, %v792_v53  ;;  %v936_v62 = vsub.f32 %v935_v55, %v1888_v54  ;;  %v680_v63 = vmin.f32 %v678_v35, %v626_v37  ;;  %v1897_v1 = vmax.f32 %v717_v39, %v626_v37 }
 0x1ec   : > { %v829_v2 = vmul.f32 1.442695, %v828_v57  ;;  %v865_v3 = vmul.f32 1.442695, %v864_v58  ;;  %v900_v4 = vsub.f32 %v899_v59, %v1890_v56  ;;  %v1900_v5 = vmax.f32 %v753_v42, %v626_v37 }
 0x1ed   : > { %1389 = vpow2.f32 %v793_v61  ;;  %v937_v6 = vmul.f32 1.442695, %v936_v62  ;;  %v681_v7 = vsub.f32 %v680_v63, %v1894_v60  ;;  %v720_v8 = vsub.f32 %v719_v47, %v1897_v1 }
 0x1ee   : > { %1391 = vpow2.f32 %v829_v2  ;;  %v901_v9 = vmul.f32 1.442695, %v900_v4  ;;  %v756_v10 = vsub.f32 %v755_v52, %v1900_v5 }
 0x1ef   : > { %1393 = vpow2.f32 %v865_v3  ;;  %v682_v11 = vmul.f32 1.442695, %v681_v7  ;;  %v721_v12 = vmul.f32 1.442695, %v720_v8 }
 0x1f0   : > { %1395 = vpow2.f32 %v937_v6  ;;  %v757_v13 = vmul.f32 1.442695, %v756_v10 }
 0x1f1   : > { %1397 = vpow2.f32 %v901_v9 }
 0x1f2   : > { %1399 = vpow2.f32 %v682_v11 }
 0x1f3   : > { %v1390_v0 = vpop.eup %1389  ;;  %1401 = vpow2.f32 %v721_v12 }
 0x1f4   : > { %v1392_v14 = vpop.eup %1391  ;;  %v795_v15 = vadd.f32 1.0, %v1390_v0  ;;  %1403 = vpow2.f32 %v757_v13 }
 0x1f5   : > { %v1394_v16 = vpop.eup %1393  ;;  %v831_v17 = vadd.f32 1.0, %v1392_v14 }
 0x1f6   : > { %v1396_v19 = vpop.eup %1395  ;;  %1405 = vlog2.f32 %v795_v15  ;;  %v867_v20 = vadd.f32 1.0, %v1394_v16 }
 0x1f7   : > { %v1398_v21 = vpop.eup %1397  ;;  %1407 = vlog2.f32 %v831_v17  ;;  %v939_v22 = vadd.f32 1.0, %v1396_v19 }
 0x1f8   : > { %v1400_v23 = vpop.eup %1399  ;;  %1409 = vlog2.f32 %v867_v20  ;;  %v903_v24 = vadd.f32 1.0, %v1398_v21 }
 0x1f9   : > { %v1402_v25 = vpop.eup %1401  ;;  %1411 = vlog2.f32 %v939_v22  ;;  %v684_v26 = vadd.f32 1.0, %v1400_v23 }
 0x1fa   : > { %v1404_v27 = vpop.eup %1403  ;;  %1413 = vlog2.f32 %v903_v24  ;;  %v723_v28 = vadd.f32 1.0, %v1402_v25 }
 0x1fb   : > { %1415 = vlog2.f32 %v684_v26  ;;  %v759_v29 = vadd.f32 1.0, %v1404_v27 }
 0x1fc   : > { %v1406_v30 = vpop.eup %1405  ;;  %1417 = vlog2.f32 %v723_v28 }
 0x1fd   : > { %v1408_v31 = vpop.eup %1407  ;;  %v797_v32 = vmul.f32 0.6931472, %v1406_v30  ;;  %1419 = vlog2.f32 %v759_v29 }
 0x1fe   : > { %v1410_v33 = vpop.eup %1409  ;;  %v833_v37 = vmul.f32 0.6931472, %v1408_v31 }
 0x1ff   : > { %v1412_v34 = vpop.eup %1411  ;;  %v798_v35 = vadd.f32 %v797_v32, %v1881_v45  ;;  %v869_v40 = vmul.f32 0.6931472, %v1410_v33 }
 0x200   : > { %v1414_v36 = vpop.eup %1413  ;;  %v941_v38 = vmul.f32 0.6931472, %v1412_v34  ;;  %v834_v49 = vadd.f32 %v833_v37, %v1883_v48 }
 0x201   : > { %v1416_v39 = vpop.eup %1415  ;;  %v905_v41 = vmul.f32 0.6931472, %v1414_v36  ;;  %814 = vmatpush.msra.mxu2 %v798_v35  ;;  %v870_v52 = vadd.f32 %v869_v40, %v1885_v50 }
 0x202   : > { %v1418_v42 = vpop.eup %1417  ;;  %v942_v43 = vadd.f32 %v941_v38, %v1888_v54  ;;  %v686_v44 = vmul.f32 0.6931472, %v1416_v39  ;;  %1270 = vmatmul.msk.f32.vlgmr.msra.gmra.mxu2 %vm534_vm3, %v1631_v18 }
 0x203   : > { %v1420_v46 = vpop.eup %1419  ;;  %v725_v47 = vmul.f32 0.6931472, %v1418_v42  ;;  %v906_v53 = vadd.f32 %v905_v41, %v1890_v56 }
 0x204   : > { %v687_v45 = vadd.f32 %v686_v44, %v1894_v60  ;;  %v761_v51 = vmul.f32 0.6931472, %v1420_v46  ;;  %958 = vmatpush.msrb.mxu2 %v942_v43 }
 0x205   : > { %v726_v55 = vadd.f32 %v725_v47, %v1897_v1 }
 0x206   : > { %706 = vmatpush.msrb.mxu3 %v687_v45  ;;  %v762_v54 = vadd.f32 %v761_v51, %v1900_v5 }
 0x207   : > { %742 = vmatpush.msrb.mxu0 %v726_v55  ;;  %1267 = vmatmul.msk.f32.vlgmr.msrb.gmra.mxu3 %vm534_vm3, %v1631_v18 }
 0x208   : > { %778 = vmatpush.msrb.mxu1 %v762_v54  ;;  %850 = vmatpush.msra.mxu3 %v834_v49 }
 0x209   : > { %886 = vmatpush.msra.mxu0 %v870_v52  ;;  %1269 = vmatmul.msk.f32.vlgmr.msrb.gmra.mxu1 %vm534_vm3, %v1631_v18 }
 0x20a   : > { %922 = vmatpush.msra.mxu1 %v906_v53  ;;  %1268 = vmatmul.msk.f32.vlgmr.msrb.gmra.mxu0 %vm534_vm3, %v1631_v18 }
 0x20b   : > { %1274 = vmatmul.msk.f32.vlgmr.msrb.gmra.mxu2 %vm534_vm3, %v1631_v18 }
 0x20f   : > { %1271 = vmatmul.msk.f32.vlgmr.msra.gmra.mxu3 %vm534_vm3, %v1631_v18 }
 0x211   : > { %1273 = vmatmul.msk.f32.vlgmr.msra.gmra.mxu1 %vm534_vm3, %v1631_v18 }
 0x212   : > { %1272 = vmatmul.msk.f32.vlgmr.msra.gmra.mxu0 %vm534_vm3, %v1631_v18 }
 0x213   : > { %1508 = shalt.err (!%p1505_p3)
}
 0x214   : > { %1290 = dma.vmem_to_hbm [thread:$0]  (%p1766_p5), %s1038_s24, 128, %s1040_s1, %s1943_s20  }
 0x215   : > { %s2047_s23 = scalar_lea.vmem [#allocation10], %s1789_s16  ;;  %s1024_s9 = sshll.u32 %s1020_s22, 4  ;;  %s1025_s9 = int_to_ptr.hbm [resolvable:$true] %s1024_s9 }
 0x216   : > { %s1022_s6 = sshll.u32 %s2047_s23, 4  ;;  %s1000_s30 = scalar_lea.sflag [#allocation7], %s1786_s26  ;;  %s1023_s6 = int_to_ptr.vmem [resolvable:$true] %s1022_s6 }
 0x217   : > { %s1523_s27 = sshra.s32 %s1025_s9, 4  ;;  %s1529_s18 = scalar_lea.hbm %s2046_s17, 16  ;;  %s1524_s27 = int_to_ptr.hbm [resolvable:$true] %s1523_s27 }
 0x218   : > { %s1525_s12 = scalar_lea.hbm %s1524_s27, 8  ;;  %p1530_p8 = scmp.lt.s32.totalorder %s1524_s27, %s2046_s17 }
 0x219   : > { %p1526_p7 = scmp.ne.s32.totalorder %s1524_s27, %s1525_s12  ;;  %p1531_p1 = scmp.lt.s32.totalorder %s1529_s18, %s1525_s12 }
 0x21b   : > { %p1527_p10 = pnand %p1526_p7, %p1766_p5  ;;  %p1532_p4 = por %p1531_p1, %p1530_p8 }
 0x21d   : > { %p1528_p2 = pneg %p1527_p10 }
 0x21f   : > { %p1533_p11 = pnand %p1532_p4, %p1528_p2 }
 0x221   : > { %1536 = shalt.err (!%p1533_p11)
}
 0x222   : > { %1289 = dma.vmem_to_hbm [thread:$0]  (%p1766_p5), %s1023_s6, 128, %s1025_s9, %s1000_s30   ;;  %vm984_vm12 = vcmask 1040384   ;;  %vm986_vm13 = vcmask 1041408   ;;  %vm988_vm14 = vcmask 1042432   ;;  %vm990_vm15 = vcmask 1043456  }
 0x223   : > { %s2048_s1 = sld [smem:[#allocation24_spill]]  ;;  %vm992_vm0 = vcmask 1044480   ;;  %vm994_vm1 = vcmask 1045504   ;;  %s443_s23 = scalar_lea.vmem [#allocation13], %s1789_s16  ;;  %vm996_vm2 = vcmask 1046528  }
 0x224   : > { %s1052_s6 = sshll.u32 %s443_s23, 4  ;;  %s1053_s6 = int_to_ptr.vmem [resolvable:$true] %s1052_s6 }
 0x229   : > { %s1050_s22 = scalar_lea.hbm %s2048_s1, %s1930_s7  ;;  %s1557_s12 = scalar_lea.hbm %s2048_s1, 16 }
 0x22a   : > { %s1054_s9 = sshll.u32 %s1050_s22, 4  ;;  %s1055_s9 = int_to_ptr.hbm [resolvable:$true] %s1054_s9 }
 0x22b   : > { %s1551_s7 = sshra.s32 %s1055_s9, 4  ;;  %s1552_s7 = int_to_ptr.hbm [resolvable:$true] %s1551_s7 }
 0x22c   : > { %s1553_s30 = scalar_lea.hbm %s1552_s7, 8  ;;  %p1558_p3 = scmp.lt.s32.totalorder %s1552_s7, %s2048_s1 }
 0x22d   : > { %p1554_p12 = scmp.ne.s32.totalorder %s1552_s7, %s1553_s30  ;;  %p1559_p7 = scmp.lt.s32.totalorder %s1557_s12, %s1553_s30 }
 0x22f   : > { %p1555_p13 = pnand %p1554_p12, %p1766_p5  ;;  %p1560_p10 = por %p1559_p7, %p1558_p3 }
 0x231   : > { %p1556_p0 = pneg %p1555_p13 }
 0x233   : > { %p1561_p2 = pnand %p1560_p10, %p1556_p0 }
 0x285   : > { %v816_v50 = vpop.f32.mrf.mxu2 }
 0x286   : > { %v780_v48 = vpop.f32.mrf.mxu1  ;;  %v970_v61 = vrot.slane %v816_v50, 5 }
 0x287   : > { %v744_v18 = vpop.f32.mrf.mxu0  ;;  %v967_v58 = vrot.slane %v780_v48, 6 }
 0x288   : > { %v964_v57 = vrot.slane %v744_v18, 7 }
 0x28a   : > { %v708_v56 = vpop.f32.mrf.mxu3 }
 0x28b   : > { %v985_v59 = vsel %vm984_vm12, %v708_v56, %v964_v57 }
 0x28c   : > { %v987_v63 = vsel %vm986_vm13, %v985_v59, %v967_v58 }
 0x28d   : > { %v989_v6 = vsel %vm988_vm14, %v987_v63, %v970_v61 }
 0x28e   : > { %v924_v62 = vpop.f32.mrf.mxu1  ;;  %v960_v1 = vpop.f32.mrf.mxu2 }
 0x28f   : > { %v888_v60 = vpop.f32.mrf.mxu0  ;;  %v979_v5 = vrot.slane %v924_v62, 2  ;;  %v982_v7 = vrot.slane %v960_v1, 1 }
 0x290   : > { %v976_v3 = vrot.slane %v888_v60, 3 }
 0x292   : > { %v852_v2 = vpop.f32.mrf.mxu3 }
 0x293   : > { %v973_v4 = vrot.slane %v852_v2, 4 }
 0x295   : > { %v991_v8 = vsel %vm990_vm15, %v989_v6, %v973_v4 }
 0x296   : > { %v993_v9 = vsel %vm992_vm0, %v991_v8, %v976_v3 }
 0x297   : > { %v995_v10 = vsel %vm994_vm1, %v993_v9, %v979_v5 }
 0x298   : > { %v997_v11 = vsel %vm996_vm2, %v995_v10, %v982_v7 }
 0x299   : > { %998 = vst.msk [vmem:[%s443_s23] sm:$0xff] %vm534_vm3, %v997_v11 }
 0x29a   : > { %1564 = shalt.err (!%p1561_p2)
}
 0x29b   : > { %1291 = dma.vmem_to_hbm [thread:$0]  (%p1766_p5), %s1053_s6, 128, %s1055_s9, %s1943_s20  }
 0x29c PF: > { %s2049_s18 = sld [smem:[#allocation18_spill]]  ;;  %p1304_p8 = pnand %p1252_p9, %p1736_p6 }
 0x29e   : > { %p1305_p1 = pneg %p1304_p8 }
 0x2a2   : > { %s1066_s19 = sand.u32 1, %s2049_s18  }
 0x2a3   : > { %s1067_s26 = scalar_lea.sflag [#allocation7], %s1066_s19 }
 0x2a4   : > { %1598 = dma.done.wait (%p1305_p1), %s1067_s26, 128  }
 0x2a5   : > { %1600 = vsyncadd (%p1305_p1), %s1067_s26, 4294967168  ;;  %s2051_s24 = sadd.s32 4294967294, %s1627_s14  }
 0x2a6   : > { %s1076_s22 = sand.u32 1, %s2051_s24  }
 0x2a7   : > { %s1077_s23 = scalar_lea.sflag [#allocation12], %s1076_s22 }
 0x2a8   : > { %1602 = dma.done.wait (%p1305_p1), %s1077_s23, 256  }
 0x2a9   : > { %1604 = vsyncadd (%p1305_p1), %s1077_s23, 4294967040  ;;  %s30_s14 = sadd.s32 1, %s1627_s14   ;;  %s2052_s30 = smov %s1611_s10 }
 0x2aa   : > { %p27_p5 = scmp.ge.s32.totalorder %s30_s14, 4   ;;  %s2053_s10 = smov %s1615_s11 }
 0x2ab   : > { %s2054_s11 = smov %s1775_s21  ;;  %s2055_s12 = smov %s1623_s13 }
 0x2ac   : > { %s2056_s13 = smov %s2058_s25  ;;  %29 = sbr.rel (!%p27_p5) target bundleno = 15 (0xf), region = 144 }
 0x2b1   :  { %1093 = vsyncpa [#allocation6], 1 }
 0x2b2   :  { %1095 = vsyncpa [#allocation6 + $0x1], 1 }
 0x2b3   :  { %1096 = vsyncpa [#allocation9], 1 }
 0x2b4   :  { %1097 = vsyncpa [#allocation7], 1 }
 0x2b5   :  { %1099 = vsyncpa [#allocation7 + $0x1], 1 }
 0x2b6   :  { %1100 = vsyncpa [#allocation12], 1 }
 0x2b7   :  { %1102 = vsyncpa [#allocation12 + $0x1], 1 }

</bundles_post_ra>
